<compile_context>
chip_gen: v6e
topology: v6e:2x2x1
jax: 0.10.0
libtpu: 0.0.40
codegen_flags: <defaults>
</compile_context>

<pallas_src>
import jax
import jax.numpy as jnp
from jax.experimental import pallas as pl
from jax.experimental.pallas import tpu as pltpu

LAYER_SIZES = [1, 16, 16, 1]

# Eigen/cephes float-tanh rational approximation coefficients (Horner on x^2).
_TANH_ALPHA = (-2.76076847742355e-16, 2.00018790482477e-13, -8.60467152213735e-11,
               5.12229709037114e-08, 1.48572235717979e-05, 6.37261928875436e-04,
               4.89352455891786e-03)
_TANH_BETA = (1.19825839466702e-06, 1.18534705686654e-04, 2.26843463243900e-03,
              4.89352518554385e-03)
_TANH_CLAMP = 7.90531110763549805


def _tanh_vpu(x):
    """Clamped rational tanh: VPU mul/add/select + one EUP vrcp.

    Keeps the second activation off the vtanh EUP path; one Newton step on the
    VPU restores ~f32 accuracy after the approximate reciprocal.
    """
    xc = jnp.clip(x, -_TANH_CLAMP, _TANH_CLAMP)
    x2 = xc * xc
    num = jnp.asarray(_TANH_ALPHA[0], x.dtype)
    for c in _TANH_ALPHA[1:]:
        num = num * x2 + jnp.asarray(c, x.dtype)
    num = xc * num
    den = jnp.asarray(_TANH_BETA[0], x.dtype)
    for c in _TANH_BETA[1:]:
        den = den * x2 + jnp.asarray(c, x.dtype)
    r = pl.reciprocal(den, approx=True)
    r = r * (2.0 - den * r)          # one Newton-Raphson step (VPU)
    return num * r


def mlp_kernel(x_ref, w2t_ref, pv_ref, o_ref):
    """Fused 1->H->H->1 MLP on a (1, tile_n) lane-dense slab of samples.

    x_ref  : (1, tile_n) f32   samples on the 128-lane axis
    w2t_ref: (H, H)            W2^T in the compute dtype (bf16 on v6e/v7x else f32)
    pv_ref : (H, 128)    f32   packed params: cols [w1, b1, w3, b2, b3, 0...]
    o_ref  : (1, tile_n) f32
    """
    cdt = w2t_ref.dtype
    x = x_ref[...]                          # (1, tile)
    pv = pv_ref[...]                        # (H, 128)
    w1c = pv[:, 0:1]                        # (H, 1)
    b1c = pv[:, 1:2]
    w3c = pv[:, 2:3]
    b2c = pv[:, 3:4]
    b3 = pv[0:1, 4:5]                       # (1, 1)

    # Layer 1: K == 1 -> broadcast multiply-add on the VPU (not a degenerate MXU
    # op); activation #1 on the EUP, in bf16 where supported (2 elem/lane).
    h1 = jnp.tanh((w1c * x + b1c).astype(cdt))                          # (H, tile)
    # Layer 2: the only real matmul -> MXU (bf16 inputs on v6e/v7x), f32 accum.
    z2 = jnp.dot(w2t_ref[...], h1, preferred_element_type=jnp.float32) + b2c
    # Activation #2 on the VPU rational so the single EUP slot only carries one
    # tanh layer plus a cheap vrcp.
    h2 = _tanh_vpu(z2)                                                  # (H, tile) f32
    # Layer 3: output width 1 -> weighted sublane reduction (VPU + XLU), not MXU.
    y = jnp.sum(w3c * h2, axis=0, keepdims=True) + b3                   # (1, tile)
    o_ref[...] = y.astype(o_ref.dtype)


def _round_up(x, m):
    return ((x + m - 1) // m) * m


def _default_compute_dtype():
    try:
        kind = jax.devices()[0].device_kind.lower()
    except Exception:
        return jnp.float32
    # bf16 EUP/VPU/MXU only pays off on v6e / v7x; keep f32 on v5e and older.
    if "v6" in kind or "v7" in kind or "7x" in kind:
        return jnp.bfloat16
    return jnp.float32


def mlp_forward(x, params, *, tile_n=32768, compute_dtype=None):
    """y = Net(x) with x of shape (N, 1); returns (N, 1)."""
    w1, b1, w2, b2, w3, b3 = params
    n, d_in = x.shape
    h = w2.shape[0]
    d_out = w3.shape[1]
    assert d_in == 1 and d_out == 1 and w1.shape == (1, h) and w3.shape == (h, 1)
    if compute_dtype is None:
        compute_dtype = _default_compute_dtype()

    # ---- batch-on-lanes layout; pad batch to a lane-aligned tile ------------
    tile_n = max(128, _round_up(int(tile_n), 128))       # lane-aligned tile width
    n_lanes = _round_up(n, 128)
    tile = min(tile_n, n_lanes)
    if n_lanes >= 256:
        # keep >=2 grid steps so ("parallel",) can shard across v7x's 2 TCs.
        tile = min(tile, max(128, (n_lanes // 2 // 128) * 128))
    n_pad = _round_up(n_lanes, tile)
    xt = x.T                                             # (1, N)
    if n_pad != n:
        xt = jnp.pad(xt, ((0, 0), (0, n_pad - n)))
    grid = (n_pad // tile,)

    # ---- consolidate six tiny params into two grid-invariant VMEM blocks ----
    w2t = w2.T.astype(compute_dtype)                     # (H, H)
    pv = jnp.zeros((h, 128), jnp.float32)                # full lane width -> unmasked vld
    pv = pv.at[:, 0].set(w1[0, :])                       # layer-1 weights (column)
    pv = pv.at[:, 1].set(b1[0, :])                       # layer-1 bias
    pv = pv.at[:, 2].set(w3[:, 0])                       # layer-3 weights (column)
    pv = pv.at[:, 3].set(b2[0, :])                       # layer-2 bias
    pv = pv.at[:, 4].set(jnp.full((h,), b3[0, 0]))       # layer-3 bias (scalar)

    cost = pl.CostEstimate(
        flops=2 * n_pad * (d_in * h + h * h + h * d_out),
        transcendentals=n_pad * h,   # one EUP-tanh layer (the other is VPU rational)
        bytes_accessed=4 * (n_pad * (d_in + d_out) + h * h + h * 128),
    )

    out_t = pl.pallas_call(
        mlp_kernel,
        out_shape=jax.ShapeDtypeStruct((d_out, n_pad), x.dtype),
        grid_spec=pl.GridSpec(
            grid=grid,
            in_specs=[
                pl.BlockSpec((d_in, tile), lambda i: (0, i)),   # streamed samples
                pl.BlockSpec(w2t.shape, lambda i: (0, 0)),      # resident weights
                pl.BlockSpec(pv.shape, lambda i: (0, 0)),       # resident packed vecs
            ],
            out_specs=pl.BlockSpec((d_out, tile), lambda i: (0, i)),
        ),
        compiler_params=pltpu.CompilerParams(
            dimension_semantics=("parallel",),   # megacore-shardable on v7x
            vmem_limit_bytes=48 * 1024 * 1024,
        ),
        cost_estimate=cost,
    )(xt, w2t, pv)

    return out_t[:, :n].T                                # back to (N, 1)


def init_params(key, layer_sizes):
    # Deterministic init mimicking nn.Linear defaults: U(-1/sqrt(fan_in), +1/sqrt(fan_in))
    params = []
    for i in range(len(layer_sizes) - 1):
        fan_in, fan_out = layer_sizes[i], layer_sizes[i + 1]
        key, kw, kb = jax.random.split(key, 3)
        bound = 1.0 / jnp.sqrt(fan_in)
        w = jax.random.uniform(kw, (fan_in, fan_out), jnp.float32, -bound, bound)
        b = jax.random.uniform(kb, (1, fan_out), jnp.float32, -bound, bound)
        params.extend([w, b])
    return tuple(params)


def mlp_ref(x, params):
    w1, b1, w2, b2, w3, b3 = params
    h = jnp.tanh(x @ w1 + b1)
    h = jnp.tanh(h @ w2 + b2)
    return h @ w3 + b3


if __name__ == "__main__":
    key = jax.random.PRNGKey(0)
    kx, kp = jax.random.split(key)

    params = init_params(kp, LAYER_SIZES)

    # Small demo batch (feature dim = layer_sizes[0] = 1), explicit f32 path,
    # tight tolerance.
    batch = 16
    x = jax.random.normal(kx, (batch, LAYER_SIZES[0]), jnp.float32)
    out = jax.block_until_ready(mlp_forward(x, params, compute_dtype=jnp.float32))
    ref = mlp_ref(x, params)
    assert out.shape == (batch, LAYER_SIZES[-1])
    assert jnp.allclose(out, ref, atol=1e-4, rtol=1e-4)

    # Multi-step grid + tail-padding path, still f32 / tight tolerance.
    batch2 = 300
    x2 = jax.random.normal(kx, (batch2, LAYER_SIZES[0]), jnp.float32)
    out2 = jax.block_until_ready(
        mlp_forward(x2, params, tile_n=128, compute_dtype=jnp.float32))
    ref2 = mlp_ref(x2, params)
    assert out2.shape == (batch2, LAYER_SIZES[-1])
    assert jnp.allclose(out2, ref2, atol=1e-4, rtol=1e-4)

    # Default (auto) dtype path: bf16 hidden pipeline on v6e/v7x, f32 elsewhere.
    # Loose tolerance covers bf16 rounding of the hidden activations.
    out3 = jax.block_until_ready(mlp_forward(x2, params))
    assert out3.shape == (batch2, LAYER_SIZES[-1])
    assert jnp.allclose(out3, ref2, atol=1e-1, rtol=1e-1)

    print("KERNEL_OK")
</pallas_src>

<mosaic_0001>
module attributes {stable_mosaic.version = 11 : i64} {
  func.func @mlp_kernel(%arg0: i32, %arg1: memref<1x128xf32, #tpu.memory_space<vmem>>, %arg2: memref<16x16xf32, #tpu.memory_space<vmem>>, %arg3: memref<16x128xf32, #tpu.memory_space<vmem>>, %arg4: memref<1x128xf32, #tpu.memory_space<vmem>>) attributes {dimension_semantics = [#tpu.dimension_semantics<parallel>], iteration_bounds = array<i64: 1>, scalar_prefetch = 0 : i64, scratch_operands = 0 : i64, tpu.core_type = #tpu.core_type<tc>, window_params = [{transform_indices = @transform_0, window_bounds = array<i64: 1, 128>}, {pipeline_mode = #tpu.pipeline_mode<synchronous>, transform_indices = @transform_1, window_bounds = array<i64: 16, 16>}, {pipeline_mode = #tpu.pipeline_mode<synchronous>, transform_indices = @transform_2, window_bounds = array<i64: 16, 128>}, {transform_indices = @transform_3, window_bounds = array<i64: 1, 128>}]} {
    %c0 = arith.constant 0 : index
    %c0_0 = arith.constant 0 : index
    %0 = vector.load %arg1[%c0, %c0_0] : memref<1x128xf32, #tpu.memory_space<vmem>>, vector<1x128xf32>
    %c0_1 = arith.constant 0 : index
    %c0_2 = arith.constant 0 : index
    %1 = vector.load %arg3[%c0_1, %c0_2] : memref<16x128xf32, #tpu.memory_space<vmem>>, vector<16x128xf32>
    %2 = vector.extract_strided_slice %1 {offsets = [0, 0], sizes = [16, 1], strides = [1, 1]} : vector<16x128xf32> to vector<16x1xf32>
    %3 = vector.extract_strided_slice %1 {offsets = [0, 1], sizes = [16, 1], strides = [1, 1]} : vector<16x128xf32> to vector<16x1xf32>
    %4 = vector.extract_strided_slice %1 {offsets = [0, 2], sizes = [16, 1], strides = [1, 1]} : vector<16x128xf32> to vector<16x1xf32>
    %5 = vector.extract_strided_slice %1 {offsets = [0, 3], sizes = [16, 1], strides = [1, 1]} : vector<16x128xf32> to vector<16x1xf32>
    %6 = vector.extract_strided_slice %1 {offsets = [0, 4], sizes = [1, 1], strides = [1, 1]} : vector<16x128xf32> to vector<1x1xf32>
    %7 = vector.broadcast %2 : vector<16x1xf32> to vector<16x128xf32>
    %8 = vector.broadcast %0 : vector<1x128xf32> to vector<16x128xf32>
    %9 = arith.mulf %7, %8 : vector<16x128xf32>
    %10 = vector.broadcast %3 : vector<16x1xf32> to vector<16x128xf32>
    %11 = arith.addf %9, %10 : vector<16x128xf32>
    %12 = math.tanh %11 : vector<16x128xf32>
    %c0_3 = arith.constant 0 : index
    %c0_4 = arith.constant 0 : index
    %13 = vector.load %arg2[%c0_3, %c0_4] : memref<16x16xf32, #tpu.memory_space<vmem>>, vector<16x16xf32>
    %cst = arith.constant dense<0.000000e+00> : vector<16x128xf32>
    %14 = tpu.matmul %13, %12, %cst {dimension_numbers = #tpu.dot_dimension_numbers<[1], [0], [0], [1], [0, 0, 1, 1], [], []>} : vector<16x16xf32>, vector<16x128xf32>, vector<16x128xf32> -> vector<16x128xf32>
    %15 = vector.broadcast %5 : vector<16x1xf32> to vector<16x128xf32>
    %16 = arith.addf %14, %15 : vector<16x128xf32>
    %cst_5 = arith.constant -7.90531111 : f32
    %cst_6 = arith.constant 7.90531111 : f32
    %17 = vector.broadcast %cst_5 : f32 to vector<16x128xf32>
    %18 = arith.maximumf %17, %16 : vector<16x128xf32>
    %19 = vector.broadcast %cst_6 : f32 to vector<16x128xf32>
    %20 = arith.minimumf %19, %18 : vector<16x128xf32>
    %21 = arith.mulf %20, %20 : vector<16x128xf32>
    %cst_7 = arith.constant -2.76076837E-16 : f32
    %22 = vector.broadcast %cst_7 : f32 to vector<16x128xf32>
    %23 = arith.mulf %22, %21 : vector<16x128xf32>
    %cst_8 = arith.constant 2.00018794E-13 : f32
    %24 = vector.broadcast %cst_8 : f32 to vector<16x128xf32>
    %25 = arith.addf %23, %24 : vector<16x128xf32>
    %26 = arith.mulf %25, %21 : vector<16x128xf32>
    %cst_9 = arith.constant -8.60467184E-11 : f32
    %27 = vector.broadcast %cst_9 : f32 to vector<16x128xf32>
    %28 = arith.addf %26, %27 : vector<16x128xf32>
    %29 = arith.mulf %28, %21 : vector<16x128xf32>
    %cst_10 = arith.constant 5.12229725E-8 : f32
    %30 = vector.broadcast %cst_10 : f32 to vector<16x128xf32>
    %31 = arith.addf %29, %30 : vector<16x128xf32>
    %32 = arith.mulf %31, %21 : vector<16x128xf32>
    %cst_11 = arith.constant 1.48572235E-5 : f32
    %33 = vector.broadcast %cst_11 : f32 to vector<16x128xf32>
    %34 = arith.addf %32, %33 : vector<16x128xf32>
    %35 = arith.mulf %34, %21 : vector<16x128xf32>
    %cst_12 = arith.constant 6.37261954E-4 : f32
    %36 = vector.broadcast %cst_12 : f32 to vector<16x128xf32>
    %37 = arith.addf %35, %36 : vector<16x128xf32>
    %38 = arith.mulf %37, %21 : vector<16x128xf32>
    %cst_13 = arith.constant 0.00489352457 : f32
    %39 = vector.broadcast %cst_13 : f32 to vector<16x128xf32>
    %40 = arith.addf %38, %39 : vector<16x128xf32>
    %41 = arith.mulf %20, %40 : vector<16x128xf32>
    %cst_14 = arith.constant 1.19825836E-6 : f32
    %42 = vector.broadcast %cst_14 : f32 to vector<16x128xf32>
    %43 = arith.mulf %42, %21 : vector<16x128xf32>
    %cst_15 = arith.constant 1.18534706E-4 : f32
    %44 = vector.broadcast %cst_15 : f32 to vector<16x128xf32>
    %45 = arith.addf %43, %44 : vector<16x128xf32>
    %46 = arith.mulf %45, %21 : vector<16x128xf32>
    %cst_16 = arith.constant 0.00226843474 : f32
    %47 = vector.broadcast %cst_16 : f32 to vector<16x128xf32>
    %48 = arith.addf %46, %47 : vector<16x128xf32>
    %49 = arith.mulf %48, %21 : vector<16x128xf32>
    %cst_17 = arith.constant 0.00489352504 : f32
    %50 = vector.broadcast %cst_17 : f32 to vector<16x128xf32>
    %51 = arith.addf %49, %50 : vector<16x128xf32>
    %52 = tpu.reciprocal %51 {approx = true} : vector<16x128xf32> -> vector<16x128xf32>
    %53 = arith.mulf %51, %52 : vector<16x128xf32>
    %cst_18 = arith.constant 2.000000e+00 : f32
    %54 = vector.broadcast %cst_18 : f32 to vector<16x128xf32>
    %55 = arith.subf %54, %53 : vector<16x128xf32>
    %56 = arith.mulf %52, %55 : vector<16x128xf32>
    %57 = arith.mulf %41, %56 : vector<16x128xf32>
    %58 = vector.broadcast %4 : vector<16x1xf32> to vector<16x128xf32>
    %59 = arith.mulf %58, %57 : vector<16x128xf32>
    %cst_19 = arith.constant dense<0.000000e+00> : vector<128xf32>
    %60 = vector.multi_reduction <add>, %59, %cst_19 [0] : vector<16x128xf32> to vector<128xf32>
    %61 = vector.shape_cast %60 : vector<128xf32> to vector<1x128xf32>
    %62 = vector.broadcast %6 : vector<1x1xf32> to vector<1x128xf32>
    %63 = arith.addf %61, %62 : vector<1x128xf32>
    %c0_20 = arith.constant 0 : index
    %c0_21 = arith.constant 0 : index
    %64 = vector.load %arg4[%c0_20, %c0_21] : memref<1x128xf32, #tpu.memory_space<vmem>>, vector<1x128xf32>
    tpu.vector_store %arg4[%c0_20, %c0_21], %63 {strides = array<i32>} : memref<1x128xf32, #tpu.memory_space<vmem>>, vector<1x128xf32>,
    return
  }
  func.func @transform_0(%arg0: i32) -> (i32, i32) {
    %c0_i32 = arith.constant 0 : i32
    %c0_i32_0 = arith.constant 0 : i32
    return %c0_i32, %arg0 : i32, i32
  }
  func.func @transform_1(%arg0: i32) -> (i32, i32) {
    %c0_i32 = arith.constant 0 : i32
    %c0_i32_0 = arith.constant 0 : i32
    %c0_i32_1 = arith.constant 0 : i32
    return %c0_i32, %c0_i32_0 : i32, i32
  }
  func.func @transform_2(%arg0: i32) -> (i32, i32) {
    %c0_i32 = arith.constant 0 : i32
    %c0_i32_0 = arith.constant 0 : i32
    %c0_i32_1 = arith.constant 0 : i32
    return %c0_i32, %c0_i32_0 : i32, i32
  }
  func.func @transform_3(%arg0: i32) -> (i32, i32) {
    %c0_i32 = arith.constant 0 : i32
    %c0_i32_0 = arith.constant 0 : i32
    return %c0_i32, %arg0 : i32, i32
  }
}

</mosaic_0001>

<bundles_post_ra>
// kernel: tpu_custom_call.1
= control target key start
LH: loop header
LB: loop body
LE: loop exit
PB: predicated region body
PF: predicated region fallthrough
CT: control target
= control target key end

     0   :  { %8 = vsyncpa [#allocation3], 0  ;;  %s446_s0 = inlined_call_operand.hbm [shape: f32[1,128], index: 0, kind: input, shape index: {}]   ;;  %s447_s1 = inlined_call_operand.hbm [shape: f32[16,16], index: 1, kind: input, shape index: {}]   ;;  %s448_s2 = inlined_call_operand.hbm [shape: f32[16,128], index: 2, kind: input, shape index: {}]   ;;  %s449_s3 = inlined_call_operand.hbm [shape: f32[1,128], index: 3, kind: output, shape index: {}]  }
   0x1   :  { %9 = vsyncpa [#allocation6], 0 }
   0x2   :  { %10 = vsyncpa [#allocation4], 0  ;;  %s401_s12 = smov [#allocation5]  }
   0x3   :  { %s26_s13 = sshll.u32 %s401_s12, 4  ;;  %s27_s13 = int_to_ptr.vmem [resolvable:$true] %s26_s13 }
   0x4   :  { %s323_s14 = scalar_lea.vmem %s27_s13, 256  ;;  %p328_p1 = scmp.lt.s32.totalorder %s27_s13, %s27_s13 }
   0x5   :  { %p324_p0 = scmp.ne.s32.totalorder %s27_s13, %s323_s14  ;;  %p329_p2 = scmp.lt.s32.totalorder %s323_s14, %s323_s14 }
   0x7   :  { %p330_p3 = por %p329_p2, %p328_p1 }
   0x9   :  { %p331_p4 = pnand %p330_p3, %p324_p0 }
   0xb   :  { %334 = shalt.err (!%p331_p4)
}
   0xc   :  { %s402_s15 = smov 128   ;;  %s403_s16 = smov 8  }
   0xd   :  { %32 = dma.hbm_to_vmem [thread:$0]  %s447_s1, 256, %s27_s13, [#allocation6], %s402_s15, %s402_s15, %s403_s16  }
   0xe   :  { %s404_s19 = smov [#allocation2]   ;;  %s405_s21 = smov [#allocation7]  }
   0xf   :  { %s17_s20 = sshll.u32 %s404_s19, 4  ;;  %s38_s22 = sshll.u32 %s405_s21, 4  ;;  %s18_s20 = int_to_ptr.vmem [resolvable:$true] %s17_s20  ;;  %s39_s22 = int_to_ptr.vmem [resolvable:$true] %s38_s22 }
  0x10   :  { %s343_s23 = scalar_lea.vmem %s18_s20, 16  ;;  %s347_s24 = scalar_lea.vmem %s18_s20, 32 }
  0x11   :  { %p344_p5 = scmp.ne.s32.totalorder %s18_s20, %s343_s23  ;;  %p348_p6 = scmp.lt.s32.totalorder %s18_s20, %s18_s20 }
  0x12   :  { %p349_p7 = scmp.lt.s32.totalorder %s347_s24, %s343_s23 }
  0x14   :  { %p350_p8 = por %p349_p7, %p348_p6 }
  0x16   :  { %p351_p9 = pnand %p350_p8, %p344_p5 }
  0x18   :  { %354 = shalt.err (!%p351_p9)
}
  0x19   :  { %20 = dma.hbm_to_vmem [thread:$0]  %s446_s0, 16, %s18_s20, [#allocation3]  }
  0x1a   :  { %s363_s27 = scalar_lea.vmem %s39_s22, 256  ;;  %p368_p11 = scmp.lt.s32.totalorder %s39_s22, %s39_s22 }
  0x1b   :  { %p364_p10 = scmp.ne.s32.totalorder %s39_s22, %s363_s27  ;;  %p369_p12 = scmp.lt.s32.totalorder %s363_s27, %s363_s27 }
  0x1d   :  { %p370_p13 = por %p369_p12, %p368_p11 }
  0x1f   :  { %p371_p0 = pnand %p370_p13, %p364_p10 }
  0x21   :  { %374 = shalt.err (!%p371_p0)
}
  0x22   :  { %44 = dma.hbm_to_vmem [thread:$0]  %s448_s2, 256, %s39_s22, [#allocation6], %s402_s15, %s402_s15, %s403_s16  }
  0x23   :  { %395 = dma.done.wait [#allocation3], 16  }
  0x24   :  { %396 = vsyncadd [#allocation3], 4294967280 }
  0x25   :  { %397 = dma.done.wait [#allocation6], 512  }
  0x26   :  { %398 = vsyncadd [#allocation6], 4294966784  ;;  %v406_v0 = vmov 1   ;;  %v407_v1 = vmov 0   ;;  %v56_v2 = vld [vmem:[#allocation7 + $0x8] sm:$0xff]  ;;  %v55_v3 = vld [vmem:[#allocation7] sm:$0xff] }
  0x27   :  { %300 = vset.pattern.permute.xlu1 %v406_v0  ;;  %299 = vset.pattern.permute.xlu0 %v407_v1  ;;  %v87_v4 = vld [vmem:[#allocation5] sm:$0xff]  ;;  %vm97_vm0 = vcmask 130048   ;;  %v408_v5 = vmov 3   ;;  %v409_v6 = vmov 2   ;;  %v410_v7 = vmov 4   ;;  %v88_v19 = vld [vmem:[#allocation5 + $0x8] sm:$0xff] }
  0x28   :  { %80 = vperm.xlu1 %300, %v56_v2   ;;  %64 = vperm.xlu0 %299, %v56_v2   ;;  %v272_v8 = vld [vmem:[#allocation2] ss:$0 sm:$0xff]  ;;  %s411_s0 = smov [#allocation8]  }
  0x29   :  { %285 = vmatprep.mubr.msk.f32.mxu0 %vm97_vm0, %v87_v4  ;;  %s262_s2 = sshll.u32 %s411_s0, 4  ;;  %s263_s2 = int_to_ptr.vmem [resolvable:$true] %s262_s2 }
  0x2a   :  { %s375_s29 = scalar_lea.vmem %s263_s2, 16  ;;  %s379_s30 = scalar_lea.vmem %s263_s2, 32 }
  0x2b   :  { %p376_p1 = scmp.ne.s32.totalorder %s263_s2, %s375_s29  ;;  %p380_p2 = scmp.lt.s32.totalorder %s263_s2, %s263_s2 }
  0x2c   :  { %76 = vperm.xlu1 %300, %v55_v3   ;;  %59 = vperm.xlu0 %299, %v55_v3   ;;  %p381_p3 = scmp.lt.s32.totalorder %s379_s30, %s375_s29 }
  0x2e   :  { %p382_p4 = por %p381_p3, %p380_p2 }
  0x30   :  { %302 = vset.pattern.permute.xlu1 %v408_v5  ;;  %301 = vset.pattern.permute.xlu0 %v408_v5  ;;  %p383_p5 = pnand %p382_p4, %p376_p1 }
  0x31   :  { %94 = vperm.xlu1 %302, %v56_v2   ;;  %90 = vperm.xlu0 %301, %v55_v3  }
  0x35   :  { %304 = vset.pattern.permute.xlu0 %v409_v6  ;;  %303 = vset.pattern.permute.xlu1 %v409_v6 }
  0x36   :  { %238 = vperm.xlu0 %304, %v56_v2   ;;  %234 = vperm.xlu1 %303, %v55_v3  }
  0x3a   :  { %305 = vset.pattern.permute.xlu1 %v410_v7  ;;  %306 = vset.pattern.permute.xlu0 %v410_v7 }
  0x3b   :  { %251 = vperm.xlu1 %305, %v55_v3  }
  0xa3   :  { %v81_v9 = vpop.permute.xlu1 %80  ;;  %v65_v10 = vpop.permute.xlu0 %64 }
  0xa4   :  { %v74_v11 = vmul.f32 %v272_v8, %v65_v10 }
  0xa6   :  { %v84_v12 = vadd.f32 %v81_v9, %v74_v11 }
  0xa7   :  { %v60_v13 = vpop.permute.xlu0 %59  ;;  %v77_v15 = vpop.permute.xlu1 %76 }
  0xa8   :  { %307 = vtanh.f32 %v84_v12  ;;  %v73_v14 = vmul.f32 %v272_v8, %v60_v13 }
  0xaa   :  { %v83_v16 = vadd.f32 %v77_v15, %v73_v14 }
  0xac   :  { %309 = vtanh.f32 %v83_v16  ;;  %v95_v20 = vpop.permute.xlu1 %94  ;;  %v91_v22 = vpop.permute.xlu0 %90 }
  0xb1   :  { %v239_v13 = vpop.permute.xlu0 %238  ;;  %v235_v14 = vpop.permute.xlu1 %234 }
  0xb5   :  { %v308_v17 = vpop.eup %307 }
  0xb6   :  { %281 = vmatprep.subr.mxu0 %v308_v17 }
  0xb7   :  { %282 = vmatpush3.msra.mxu0 %v308_v17 }
  0xb9   :  { %v310_v18 = vpop.eup %309 }
  0xba   :  { %283 = vmatprep.subr.mxu0 %v310_v18 }
  0xbb   :  { %284 = vmatpush3.msra.mxu0 %v310_v18 }
  0xbc   :  { %286 = vmatmul.mubr.msk.f32.vlgmr.msra.gmra.mxu0 %vm97_vm0, %v88_v19 }
 0x17c   :  { %v287_v21 = vpop.f32.mrf.mxu0 }
 0x17d   :  { %v176_v23 = vadd.f32 %v287_v21, %v95_v20 }
 0x17e   :  { %v170_v24 = vpop.f32.mrf.mxu0 }
 0x17f   :  { %v276_v25 = vclamps-f32 %v176_v23, 7.905311  ;;  %v171_v26 = vadd.f32 %v170_v24, %v91_v22  ;;  %v252_v24 = vpop.permute.xlu1 %251 }
 0x181   :  { %v184_v27 = vmul.f32 %v276_v25, %v276_v25  ;;  %v275_v28 = vclamps-f32 %v171_v26, 7.905311 }
 0x183   :  { %v186_v29 = vmul.f32 -2.7607684e-16, %v184_v27  ;;  %v183_v30 = vmul.f32 %v275_v28, %v275_v28  ;;  %v212_v31 = vmul.f32 1.1982584e-06, %v184_v27 }
 0x185   :  { %v188_v32 = vadd.f32 2.000188e-13, %v186_v29  ;;  %v185_v33 = vmul.f32 -2.7607684e-16, %v183_v30  ;;  %v214_v34 = vadd.f32 0.00011853471, %v212_v31 }
 0x186   :  { %v211_v35 = vmul.f32 1.1982584e-06, %v183_v30 }
 0x187   :  { %v190_v36 = vmul.f32 %v188_v32, %v184_v27  ;;  %v187_v37 = vadd.f32 2.000188e-13, %v185_v33  ;;  %v216_v38 = vmul.f32 %v214_v34, %v184_v27 }
 0x188   :  { %v213_v39 = vadd.f32 0.00011853471, %v211_v35 }
 0x189   :  { %v192_v40 = vadd.f32 -8.604672e-11, %v190_v36  ;;  %v189_v41 = vmul.f32 %v187_v37, %v183_v30  ;;  %v218_v42 = vadd.f32 0.0022684347, %v216_v38 }
 0x18a   :  { %v215_v43 = vmul.f32 %v213_v39, %v183_v30 }
 0x18b   :  { %v194_v44 = vmul.f32 %v192_v40, %v184_v27  ;;  %v191_v45 = vadd.f32 -8.604672e-11, %v189_v41  ;;  %v220_v46 = vmul.f32 %v218_v42, %v184_v27 }
 0x18c   :  { %v217_v47 = vadd.f32 0.0022684347, %v215_v43 }
 0x18d   :  { %v196_v48 = vadd.f32 5.1222973e-08, %v194_v44  ;;  %v193_v49 = vmul.f32 %v191_v45, %v183_v30  ;;  %v222_v50 = vadd.f32 0.004893525, %v220_v46 }
 0x18e   :  { %v219_v51 = vmul.f32 %v217_v47, %v183_v30 }
 0x18f   :  { %v198_v52 = vmul.f32 %v196_v48, %v184_v27  ;;  %v195_v53 = vadd.f32 5.1222973e-08, %v193_v49  ;;  %311 = vrcp.f32 %v222_v50 }
 0x190   :  { %v221_v54 = vadd.f32 0.004893525, %v219_v51 }
 0x191   :  { %v200_v55 = vadd.f32 1.48572235e-05, %v198_v52  ;;  %v197_v56 = vmul.f32 %v195_v53, %v183_v30 }
 0x192   :  { %313 = vrcp.f32 %v221_v54 }
 0x193   :  { %v202_v57 = vmul.f32 %v200_v55, %v184_v27  ;;  %v199_v58 = vadd.f32 1.48572235e-05, %v197_v56 }
 0x195   :  { %v201_v59 = vmul.f32 %v199_v58, %v183_v30  ;;  %v204_v60 = vadd.f32 0.00063726195, %v202_v57 }
 0x197   :  { %v203_v61 = vadd.f32 0.00063726195, %v201_v59  ;;  %v206_v62 = vmul.f32 %v204_v60, %v184_v27 }
 0x199   :  { %v205_v0 = vmul.f32 %v203_v61, %v183_v30  ;;  %v208_v2 = vadd.f32 0.0048935246, %v206_v62 }
 0x19b   :  { %v207_v5 = vadd.f32 0.0048935246, %v205_v0  ;;  %v210_v8 = vmul.f32 %v276_v25, %v208_v2 }
 0x19c   :  { %v312_v63 = vpop.eup %311 }
 0x19d   :  { %v226_v1 = vmul.f32 %v312_v63, %v222_v50  ;;  %v209_v10 = vmul.f32 %v275_v28, %v207_v5 }
 0x19f   :  { %v314_v3 = vpop.eup %313  ;;  %v228_v4 = vsub.f32 2.0, %v226_v1 }
 0x1a0   :  { %v225_v6 = vmul.f32 %v314_v3, %v221_v54 }
 0x1a1   :  { %v230_v7 = vmul.f32 %v312_v63, %v228_v4 }
 0x1a2   :  { %v227_v9 = vsub.f32 2.0, %v225_v6 }
 0x1a3   :  { %v232_v11 = vmul.f32 %v230_v7, %v210_v8 }
 0x1a4   :  { %v229_v12 = vmul.f32 %v314_v3, %v227_v9 }
 0x1a5   :  { %v242_v16 = vmul.f32 %v239_v13, %v232_v11 }
 0x1a6   :  { %v231_v15 = vmul.f32 %v229_v12, %v209_v10 }
 0x1a8   :  { %v241_v17 = vmul.f32 %v235_v14, %v231_v15 }
 0x1aa   :  { %v243_v18 = vadd.f32 %v242_v16, %v241_v17 }
 0x1ac   :  { %v244_v19 = vrot.slane %v243_v18, 4 }
 0x1ae   :  { %v245_v20 = vadd.f32 %v244_v19, %v243_v18 }
 0x1b0   :  { %v246_v21 = vrot.slane %v245_v20, 2 }
 0x1b2   :  { %v247_v22 = vadd.f32 %v246_v21, %v245_v20 }
 0x1b4   :  { %v248_v23 = vrot.slane %v247_v22, 1 }
 0x1b6   :  { %v249_v26 = vadd.f32 %v248_v23, %v247_v22 }
 0x1b8   :  { %v254_v25 = vadd.f32 %v252_v24, %v249_v26 }
 0x1ba   :  { %255 = vst [vmem:[#allocation8] sm:$0x1] %v254_v25 }
 0x1bb   :  { %386 = shalt.err (!%p383_p5)
}
 0x1bc   :  { %265 = dma.vmem_to_hbm [thread:$0]  %s263_s2, 16, %s449_s3, [#allocation4]  }
 0x1bd   :  { %399 = dma.done.wait [#allocation4], 16  }
 0x1be   :  { %400 = vsyncadd [#allocation4], 4294967280 }
 0x1bf   :  { %269 = vsyncpa [#allocation3], 1 }
 0x1c0   :  { %270 = vsyncpa [#allocation6], 1 }
 0x1c1   :  { %271 = vsyncpa [#allocation4], 1 }

</bundles_post_ra>
